<compile_context>
chip_gen: v5e
topology: v5e:2x2
jax: 0.10.0
libtpu: 0.0.40
codegen_flags: <defaults>
</compile_context>

<pallas_src>
import jax
import jax.numpy as jnp
from jax.experimental import pallas as pl
from jax.experimental.pallas import tpu as pltpu


# ---------------------------------------------------------------------------
# Fused Pallas kernel: 2x (A_hat @ (H @ W) + b, ReLU) -> folded conv3+pool -> linear
# ---------------------------------------------------------------------------
def _gcn_fused_kernel(a_ref, pa_ref, x_ref,
                      w1_ref, b1_ref, w2_ref, b2_ref,
                      w3_ref, b3_ref, wl_ref, bl_ref, o_ref):
    a = a_ref[...]  # bf16 [Np, Np] normalized adjacency, resident for both ReLU layers

    def gcn_relu_layer(h_bf16, w_ref, b_ref):
        # feature transform: H @ W   (bf16 operands, f32 accumulation on MXU)
        xw = jnp.dot(h_bf16, w_ref[...], preferred_element_type=jnp.float32)
        # neighborhood aggregation: A_hat @ (H W)   (f32 accumulation on MXU)
        out = jnp.dot(a, xw.astype(jnp.bfloat16),
                      preferred_element_type=jnp.float32) + b_ref[...]
        return jnp.maximum(out, 0.0).astype(jnp.bfloat16)   # f32 epilogue (v5e-safe)

    h = gcn_relu_layer(x_ref[...], w1_ref, b1_ref)   # conv1 + relu
    h = gcn_relu_layer(h,          w2_ref, b2_ref)   # conv2 + relu

    # conv3 folded into global_mean_pool (no ReLU between them):
    #   pooled = P @ (A @ (H2 W3) + b3) = (P @ A) @ (H2 W3) + b3
    # bias folds exactly because each mean-pool row of P sums to 1.
    hw3 = jnp.dot(h, w3_ref[...], preferred_element_type=jnp.float32)
    pooled = jnp.dot(pa_ref[...], hw3.astype(jnp.bfloat16),
                     preferred_element_type=jnp.float32) + b3_ref[...]

    # dropout(p=0.5) in eval mode is identity (training=False).
    logits = jnp.dot(pooled.astype(jnp.bfloat16), wl_ref[...],
                     preferred_element_type=jnp.float32) + bl_ref[...]
    o_ref[...] = logits.astype(o_ref.dtype)


def _round_up(x, m):
    return ((x + m - 1) // m) * m


def _pad2d(x, rows, cols):
    return jnp.pad(x, ((0, rows - x.shape[0]), (0, cols - x.shape[1])))


def gcn_forward_fused(params, x, a_hat, pool_mat):
    """Single-pallas_call fused forward. Returns [G, num_classes] logits."""
    n, f_in = x.shape
    hidden = params["w1"].shape[1]
    num_classes = params["w_lin"].shape[1]
    g = pool_mat.shape[0]

    # lane-dense padded dims (last dim multiple of 128, rows multiple of 8)
    n_p = _round_up(n, 128)          # node axis = K-dim of A_hat @ XW
    f_p = _round_up(f_in, 128)
    h_p = _round_up(hidden, 128)
    c_p = _round_up(num_classes, 128)
    g_p = _round_up(g, 8)

    bf = jnp.bfloat16
    # Precompute P @ A_hat in f32 (conv3 fold), then pad & cast once for the MXU.
    pa = pool_mat @ a_hat                                   # [G, N] f32
    a_pad = _pad2d(a_hat, n_p, n_p).astype(bf)
    pa_pad = _pad2d(pa, g_p, n_p).astype(bf)
    x_pad = _pad2d(x, n_p, f_p).astype(bf)
    w1 = _pad2d(params["w1"], f_p, h_p).astype(bf)
    w2 = _pad2d(params["w2"], h_p, h_p).astype(bf)
    w3 = _pad2d(params["w3"], h_p, h_p).astype(bf)
    wl = _pad2d(params["w_lin"], h_p, c_p).astype(bf)
    b1 = _pad2d(params["b1"].reshape(1, -1), 1, h_p)        # f32 biases
    b2 = _pad2d(params["b2"].reshape(1, -1), 1, h_p)
    b3 = _pad2d(params["b3"].reshape(1, -1), 1, h_p)
    bl = _pad2d(params["b_lin"].reshape(1, -1), 1, c_p)

    operands = (a_pad, pa_pad, x_pad, w1, b1, w2, b2, w3, b3, wl, bl)

    # Explicit scoped-VMEM budget sized from the real (single-buffered) footprint,
    # with generous headroom; keeps v5e (16 MiB default) and v7x (64 MiB physical) happy.
    total_bytes = sum(int(op.nbytes) for op in operands) + g_p * c_p * 4
    vmem_limit = int(min(100 * 1024 * 1024, max(4 * 1024 * 1024, 4 * total_bytes)))

    vmem_spec = pl.BlockSpec(memory_space=pltpu.MemorySpace.VMEM)

    out = pl.pallas_call(
        _gcn_fused_kernel,
        out_shape=jax.ShapeDtypeStruct((g_p, c_p), jnp.float32),
        # Gridless call: whole arrays, single-buffered VMEM residency.
        in_specs=[vmem_spec] * len(operands),
        out_specs=vmem_spec,
        compiler_params=pltpu.CompilerParams(vmem_limit_bytes=vmem_limit),
    )(*operands)

    return out[:g, :num_classes]


# ---------------------------------------------------------------------------
# Glue (plain JAX): dense normalized adjacency, pooling matrix
# ---------------------------------------------------------------------------
def build_norm_adj(edge_index, num_nodes):
    """GCNConv propagation matrix: D^-1/2 (A + I) D^-1/2 (dense).
    Duplicate edges accumulate (matches PyG GCNConv degree handling).
    TODO(synk): skip this dense scatter-add for large graphs (pass CSR instead)."""
    src, dst = edge_index[0], edge_index[1]
    a = jnp.zeros((num_nodes, num_nodes), jnp.float32)
    a = a.at[dst, src].add(1.0)                      # messages flow src -> dst
    a = a + jnp.eye(num_nodes, dtype=jnp.float32)    # add self-loops
    deg = a.sum(axis=1)
    d_inv_sqrt = jax.lax.rsqrt(jnp.maximum(deg, 1e-12))
    return a * d_inv_sqrt[:, None] * d_inv_sqrt[None, :]


def build_pool_matrix(batch, num_graphs):
    """global_mean_pool as a [G, N] averaging matrix (rows sum to 1)."""
    onehot = (batch[None, :] == jnp.arange(num_graphs)[:, None]).astype(jnp.float32)
    counts = jnp.maximum(onehot.sum(axis=1, keepdims=True), 1.0)
    return onehot / counts


def gcn_forward(params, x, edge_index, batch, num_graphs):
    n = x.shape[0]
    a_hat = build_norm_adj(edge_index, n)
    pool_mat = build_pool_matrix(batch, num_graphs)
    return gcn_forward_fused(params, x, a_hat, pool_mat)


def init_params(key, num_node_features, hidden_channels, num_classes):
    """Deterministic glorot-style init matching the module's parameter shapes."""
    ks = jax.random.split(key, 4)

    def glorot(k, shape):
        fan_in, fan_out = shape
        scale = jnp.sqrt(6.0 / (fan_in + fan_out))
        return jax.random.uniform(k, shape, jnp.float32, -scale, scale)

    return {
        "w1": glorot(ks[0], (num_node_features, hidden_channels)),
        "b1": jnp.zeros((hidden_channels,), jnp.float32),
        "w2": glorot(ks[1], (hidden_channels, hidden_channels)),
        "b2": jnp.zeros((hidden_channels,), jnp.float32),
        "w3": glorot(ks[2], (hidden_channels, hidden_channels)),
        "b3": jnp.zeros((hidden_channels,), jnp.float32),
        "w_lin": glorot(ks[3], (hidden_channels, num_classes)),
        "b_lin": jnp.zeros((num_classes,), jnp.float32),
    }


# ---------------------------------------------------------------------------
# Main
# ---------------------------------------------------------------------------
if __name__ == "__main__":
    key = jax.random.PRNGKey(0)
    k_x, k_p = jax.random.split(key)

    num_node_features = 7     # dataset.num_node_features (e.g. MUTAG-like)
    hidden_channels = 32
    num_classes = 2           # dataset.num_classes
    nodes_per_graph = 6
    num_graphs = 2
    num_nodes = num_graphs * nodes_per_graph   # 12 nodes total

    # Small deterministic batched graph: two undirected 6-node chains.
    edges = []
    for gidx in range(num_graphs):
        off = gidx * nodes_per_graph
        for i in range(nodes_per_graph - 1):
            edges.append((off + i, off + i + 1))
            edges.append((off + i + 1, off + i))
    edge_index = jnp.array(edges, dtype=jnp.int32).T          # [2, E]
    batch = jnp.repeat(jnp.arange(num_graphs, dtype=jnp.int32),
                       nodes_per_graph)                        # [N]

    x = jax.random.normal(k_x, (num_nodes, num_node_features), jnp.float32)
    params = init_params(k_p, num_node_features, hidden_channels, num_classes)

    logits = gcn_forward(params, x, edge_index, batch, num_graphs)  # [G, C]
    jax.block_until_ready(logits)

    assert logits.shape == (num_graphs, num_classes)
    assert bool(jnp.all(jnp.isfinite(logits)))
    print("KERNEL_OK")
</pallas_src>

<mosaic_0001>
module attributes {stable_mosaic.version = 11 : i64} {
  func.func @_gcn_fused_kernel(%arg0: memref<128x128xbf16, #tpu.memory_space<vmem>>, %arg1: memref<8x128xbf16, #tpu.memory_space<vmem>>, %arg2: memref<128x128xbf16, #tpu.memory_space<vmem>>, %arg3: memref<128x128xbf16, #tpu.memory_space<vmem>>, %arg4: memref<1x128xf32, #tpu.memory_space<vmem>>, %arg5: memref<128x128xbf16, #tpu.memory_space<vmem>>, %arg6: memref<1x128xf32, #tpu.memory_space<vmem>>, %arg7: memref<128x128xbf16, #tpu.memory_space<vmem>>, %arg8: memref<1x128xf32, #tpu.memory_space<vmem>>, %arg9: memref<128x128xbf16, #tpu.memory_space<vmem>>, %arg10: memref<1x128xf32, #tpu.memory_space<vmem>>, %arg11: memref<8x128xf32, #tpu.memory_space<vmem>>) attributes {dimension_semantics = [], scalar_prefetch = 0 : i64, scratch_operands = 0 : i64, tpu.core_type = #tpu.core_type<tc>} {
    %c0 = arith.constant 0 : index
    %c0_0 = arith.constant 0 : index
    %0 = vector.load %arg0[%c0, %c0_0] : memref<128x128xbf16, #tpu.memory_space<vmem>>, vector<128x128xbf16>
    %c0_1 = arith.constant 0 : index
    %c0_2 = arith.constant 0 : index
    %1 = vector.load %arg2[%c0_1, %c0_2] : memref<128x128xbf16, #tpu.memory_space<vmem>>, vector<128x128xbf16>
    %c0_3 = arith.constant 0 : index
    %c0_4 = arith.constant 0 : index
    %2 = vector.load %arg3[%c0_3, %c0_4] : memref<128x128xbf16, #tpu.memory_space<vmem>>, vector<128x128xbf16>
    %cst = arith.constant dense<0.000000e+00> : vector<128x128xf32>
    %3 = tpu.matmul %1, %2, %cst {dimension_numbers = #tpu.dot_dimension_numbers<[1], [0], [0], [1], [0, 0, 1, 1], [], []>} : vector<128x128xbf16>, vector<128x128xbf16>, vector<128x128xf32> -> vector<128x128xf32>
    %4 = arith.truncf %3 : vector<128x128xf32> to vector<128x128xbf16>
    %cst_5 = arith.constant dense<0.000000e+00> : vector<128x128xf32>
    %5 = tpu.matmul %0, %4, %cst_5 {dimension_numbers = #tpu.dot_dimension_numbers<[1], [0], [0], [1], [0, 0, 1, 1], [], []>} : vector<128x128xbf16>, vector<128x128xbf16>, vector<128x128xf32> -> vector<128x128xf32>
    %c0_6 = arith.constant 0 : index
    %c0_7 = arith.constant 0 : index
    %6 = vector.load %arg4[%c0_6, %c0_7] : memref<1x128xf32, #tpu.memory_space<vmem>>, vector<1x128xf32>
    %7 = vector.broadcast %6 : vector<1x128xf32> to vector<128x128xf32>
    %8 = arith.addf %5, %7 : vector<128x128xf32>
    %cst_8 = arith.constant 0.000000e+00 : f32
    %9 = vector.broadcast %cst_8 : f32 to vector<128x128xf32>
    %10 = arith.maximumf %8, %9 : vector<128x128xf32>
    %11 = arith.truncf %10 : vector<128x128xf32> to vector<128x128xbf16>
    %c0_9 = arith.constant 0 : index
    %c0_10 = arith.constant 0 : index
    %12 = vector.load %arg5[%c0_9, %c0_10] : memref<128x128xbf16, #tpu.memory_space<vmem>>, vector<128x128xbf16>
    %cst_11 = arith.constant dense<0.000000e+00> : vector<128x128xf32>
    %13 = tpu.matmul %11, %12, %cst_11 {dimension_numbers = #tpu.dot_dimension_numbers<[1], [0], [0], [1], [0, 0, 1, 1], [], []>} : vector<128x128xbf16>, vector<128x128xbf16>, vector<128x128xf32> -> vector<128x128xf32>
    %14 = arith.truncf %13 : vector<128x128xf32> to vector<128x128xbf16>
    %cst_12 = arith.constant dense<0.000000e+00> : vector<128x128xf32>
    %15 = tpu.matmul %0, %14, %cst_12 {dimension_numbers = #tpu.dot_dimension_numbers<[1], [0], [0], [1], [0, 0, 1, 1], [], []>} : vector<128x128xbf16>, vector<128x128xbf16>, vector<128x128xf32> -> vector<128x128xf32>
    %c0_13 = arith.constant 0 : index
    %c0_14 = arith.constant 0 : index
    %16 = vector.load %arg6[%c0_13, %c0_14] : memref<1x128xf32, #tpu.memory_space<vmem>>, vector<1x128xf32>
    %17 = vector.broadcast %16 : vector<1x128xf32> to vector<128x128xf32>
    %18 = arith.addf %15, %17 : vector<128x128xf32>
    %cst_15 = arith.constant 0.000000e+00 : f32
    %19 = vector.broadcast %cst_15 : f32 to vector<128x128xf32>
    %20 = arith.maximumf %18, %19 : vector<128x128xf32>
    %21 = arith.truncf %20 : vector<128x128xf32> to vector<128x128xbf16>
    %c0_16 = arith.constant 0 : index
    %c0_17 = arith.constant 0 : index
    %22 = vector.load %arg7[%c0_16, %c0_17] : memref<128x128xbf16, #tpu.memory_space<vmem>>, vector<128x128xbf16>
    %cst_18 = arith.constant dense<0.000000e+00> : vector<128x128xf32>
    %23 = tpu.matmul %21, %22, %cst_18 {dimension_numbers = #tpu.dot_dimension_numbers<[1], [0], [0], [1], [0, 0, 1, 1], [], []>} : vector<128x128xbf16>, vector<128x128xbf16>, vector<128x128xf32> -> vector<128x128xf32>
    %c0_19 = arith.constant 0 : index
    %c0_20 = arith.constant 0 : index
    %24 = vector.load %arg1[%c0_19, %c0_20] : memref<8x128xbf16, #tpu.memory_space<vmem>>, vector<8x128xbf16>
    %25 = arith.truncf %23 : vector<128x128xf32> to vector<128x128xbf16>
    %cst_21 = arith.constant dense<0.000000e+00> : vector<8x128xf32>
    %26 = tpu.matmul %24, %25, %cst_21 {dimension_numbers = #tpu.dot_dimension_numbers<[1], [0], [0], [1], [0, 0, 1, 1], [], []>} : vector<8x128xbf16>, vector<128x128xbf16>, vector<8x128xf32> -> vector<8x128xf32>
    %c0_22 = arith.constant 0 : index
    %c0_23 = arith.constant 0 : index
    %27 = vector.load %arg8[%c0_22, %c0_23] : memref<1x128xf32, #tpu.memory_space<vmem>>, vector<1x128xf32>
    %28 = vector.broadcast %27 : vector<1x128xf32> to vector<8x128xf32>
    %29 = arith.addf %26, %28 : vector<8x128xf32>
    %30 = arith.truncf %29 : vector<8x128xf32> to vector<8x128xbf16>
    %c0_24 = arith.constant 0 : index
    %c0_25 = arith.constant 0 : index
    %31 = vector.load %arg9[%c0_24, %c0_25] : memref<128x128xbf16, #tpu.memory_space<vmem>>, vector<128x128xbf16>
    %cst_26 = arith.constant dense<0.000000e+00> : vector<8x128xf32>
    %32 = tpu.matmul %30, %31, %cst_26 {dimension_numbers = #tpu.dot_dimension_numbers<[1], [0], [0], [1], [0, 0, 1, 1], [], []>} : vector<8x128xbf16>, vector<128x128xbf16>, vector<8x128xf32> -> vector<8x128xf32>
    %c0_27 = arith.constant 0 : index
    %c0_28 = arith.constant 0 : index
    %33 = vector.load %arg10[%c0_27, %c0_28] : memref<1x128xf32, #tpu.memory_space<vmem>>, vector<1x128xf32>
    %34 = vector.broadcast %33 : vector<1x128xf32> to vector<8x128xf32>
    %35 = arith.addf %32, %34 : vector<8x128xf32>
    %c0_29 = arith.constant 0 : index
    %c0_30 = arith.constant 0 : index
    %36 = vector.load %arg11[%c0_29, %c0_30] : memref<8x128xf32, #tpu.memory_space<vmem>>, vector<8x128xf32>
    tpu.vector_store %arg11[%c0_29, %c0_30], %35 {strides = array<i32>} : memref<8x128xf32, #tpu.memory_space<vmem>>, vector<8x128xf32>,
    return
  }
}

</mosaic_0001>

<bundles_post_ra>
// kernel: tpu_custom_call.1
= control target key start
LH: loop header
LB: loop body
LE: loop exit
PB: predicated region body
PF: predicated region fallthrough
CT: control target
= control target key end

     0   :  { %16 = vsyncpa [#allocation3], 0  ;;  %s1540_s0 = inlined_call_operand.hbm [shape: bf16[128,128], index: 0, kind: input, shape index: {}]   ;;  %s1541_s1 = inlined_call_operand.hbm [shape: bf16[8,128], index: 1, kind: input, shape index: {}]   ;;  %s1542_s2 = inlined_call_operand.hbm [shape: bf16[128,128], index: 2, kind: input, shape index: {}]   ;;  %s1543_s3 = inlined_call_operand.hbm [shape: bf16[128,128], index: 3, kind: input, shape index: {}]   ;;  %s1544_s4 = inlined_call_operand.vmem [shape: f32[1,128], index: 4, kind: input, shape index: {}]   ;;  %s1545_s5 = inlined_call_operand.hbm [shape: bf16[128,128], index: 5, kind: input, shape index: {}]   ;;  %s1546_s6 = inlined_call_operand.vmem [shape: f32[1,128], index: 6, kind: input, shape index: {}]   ;;  %s1547_s7 = inlined_call_operand.hbm [shape: bf16[128,128], index: 7, kind: input, shape index: {}]   ;;  %s1548_s8 = inlined_call_operand.vmem [shape: f32[1,128], index: 8, kind: input, shape index: {}]   ;;  %s1549_s9 = inlined_call_operand.hbm [shape: bf16[128,128], index: 9, kind: input, shape index: {}]   ;;  %s1550_s10 = inlined_call_operand.vmem [shape: f32[1,128], index: 10, kind: input, shape index: {}]   ;;  %s1551_s11 = inlined_call_operand.hbm [shape: f32[8,128], index: 11, kind: output, shape index: {}]  }
   0x1   :  { %17 = vsyncpa [#allocation6], 0 }
   0x2   :  { %18 = vsyncpa [#allocation9], 0 }
   0x3   :  { %19 = vsyncpa [#allocation12], 0  ;;  %s39_s19 = sshll.u32 %s1541_s1, 4  ;;  %s40_s19 = int_to_ptr.hbm [resolvable:$true] %s39_s19 }
   0x4   :  { %20 = vsyncpa [#allocation4], 0  ;;  %s1384_s20 = smov [#allocation5]   ;;  %s62_s24 = sshll.u32 %s1543_s3, 4  ;;  %s63_s24 = int_to_ptr.hbm [resolvable:$true] %s62_s24 }
   0x5   :  { %s41_s21 = sshll.u32 %s1384_s20, 4  ;;  %s1385_s25 = smov [#allocation8]   ;;  %s42_s21 = int_to_ptr.vmem [resolvable:$true] %s41_s21 }
   0x6   :  { %44 = dma.hbm_to_vmem [thread:$0]  %s40_s19, 64, %s42_s21, [#allocation6]  }
   0x7   :  { %s64_s26 = sshll.u32 %s1385_s25, 4  ;;  %s92_s29 = sshll.u32 %s1547_s7, 4  ;;  %s65_s26 = int_to_ptr.vmem [resolvable:$true] %s64_s26  ;;  %s93_s29 = int_to_ptr.hbm [resolvable:$true] %s92_s29 }
   0x8   :  { %s1386_s1 = smov 64   ;;  %s1387_s30 = smov 4  }
   0x9   :  { %70 = dma.hbm_to_vmem [thread:$0]  %s63_s24, 1024, %s65_s26, [#allocation9], %s1386_s1, %s1386_s1, %s1387_s30  }
   0xa   :  { %s25_s14 = sshll.u32 %s1540_s0, 4  ;;  %s1388_s3 = smov [#allocation11]   ;;  %s26_s14 = int_to_ptr.hbm [resolvable:$true] %s25_s14 }
   0xb   :  { %s94_s15 = sshll.u32 %s1388_s3, 4  ;;  %s1389_s7 = smov [#allocation2]   ;;  %s95_s15 = int_to_ptr.vmem [resolvable:$true] %s94_s15 }
   0xc   :  { %100 = dma.hbm_to_vmem [thread:$0]  %s93_s29, 1024, %s95_s15, [#allocation12], %s1386_s1, %s1386_s1, %s1387_s30  }
   0xd   :  { %s27_s16 = sshll.u32 %s1389_s7, 4  ;;  %s49_s19 = sshll.u32 %s1542_s2, 4  ;;  %s28_s16 = int_to_ptr.vmem [resolvable:$true] %s27_s16  ;;  %s50_s19 = int_to_ptr.hbm [resolvable:$true] %s49_s19 }
   0xe   :  { %33 = dma.hbm_to_vmem [thread:$0]  %s26_s14, 1024, %s28_s16, [#allocation3], %s1386_s1, %s1386_s1, %s1387_s30  }
   0xf   :  { %s77_s21 = sshll.u32 %s1545_s5, 4  ;;  %s1390_s22 = smov [#allocation7]   ;;  %s78_s21 = int_to_ptr.hbm [resolvable:$true] %s77_s21 }
  0x10   :  { %s51_s23 = sshll.u32 %s1390_s22, 4  ;;  %s1391_s24 = smov [#allocation10]   ;;  %s52_s23 = int_to_ptr.vmem [resolvable:$true] %s51_s23 }
  0x11   :  { %57 = dma.hbm_to_vmem [thread:$0]  %s50_s19, 1024, %s52_s23, [#allocation6], %s1386_s1, %s1386_s1, %s1387_s30  }
  0x12   :  { %s79_s2 = sshll.u32 %s1391_s24, 4  ;;  %s107_s27 = sshll.u32 %s1549_s9, 4  ;;  %s80_s2 = int_to_ptr.vmem [resolvable:$true] %s79_s2  ;;  %s108_s27 = int_to_ptr.hbm [resolvable:$true] %s107_s27 }
  0x13   :  { %85 = dma.hbm_to_vmem [thread:$0]  %s78_s21, 1024, %s80_s2, [#allocation9], %s1386_s1, %s1386_s1, %s1387_s30  }
  0x14   :  { %s1392_s5 = smov [#allocation13]  }
  0x15   :  { %s109_s28 = sshll.u32 %s1392_s5, 4  ;;  %s110_s28 = int_to_ptr.vmem [resolvable:$true] %s109_s28 }
  0x16   :  { %115 = dma.hbm_to_vmem [thread:$0]  %s108_s27, 1024, %s110_s28, [#allocation12], %s1386_s1, %s1386_s1, %s1387_s30  }
  0x17   :  { %1374 = dma.done.wait [#allocation3], 1024  }
  0x18   :  { %1375 = vsyncadd [#allocation3], 4294966272 }
  0x19   :  { %1376 = dma.done.wait [#allocation6], 1088  }
  0x1a   :  { %1377 = vsyncadd [#allocation6], 4294966208 }
  0x1b   :  { %1378 = dma.done.wait [#allocation9], 2048  }
  0x1c   :  { %1379 = vsyncadd [#allocation9], 4294965248 }
  0x1d   :  { %1380 = dma.done.wait [#allocation12], 2048  }
  0x1e   :  { %1381 = vsyncadd [#allocation12], 4294965248  ;;  %v1127_v0 = vld [vmem:[#allocation8 + $0x38] sm:$0xff]  ;;  %v1126_v1 = vld [vmem:[#allocation8 + $0x30] sm:$0xff]  ;;  %s1393_s14 = smov [#allocation14]   ;;  %s899_s16 = sshll.u32 %s1551_s11, 4  ;;  %s900_s16 = int_to_ptr.hbm [resolvable:$true] %s899_s16 }
  0x1f   :  { %1153 = vmatpush.bf16.msra.mxu3 %v1127_v0  ;;  %290 = vmatpush.bf16.msra.mxu0 %v1127_v0  ;;  %v1125_v2 = vld [vmem:[#allocation8 + $0x28] sm:$0xff]  ;;  %v1124_v3 = vld [vmem:[#allocation8 + $0x20] sm:$0xff]  ;;  %v1123_v4 = vld [vmem:[#allocation8 + $0x18] sm:$0xff]  ;;  %s897_s3 = sshll.u32 %s1393_s14, 4  ;;  %s898_s3 = int_to_ptr.vmem [resolvable:$true] %s897_s3 }
  0x20   :  { %1152 = vmatpush.bf16.msra.mxu1 %v1127_v0  ;;  %v1122_v5 = vld [vmem:[#allocation8 + $0x10] sm:$0xff]  ;;  %v1121_v6 = vld [vmem:[#allocation8 + $0x8] sm:$0xff]  ;;  %v1120_v7 = vld [vmem:[#allocation8] sm:$0xff] }
  0x21   :  { %v1117_v8 = vld [vmem:[#allocation7 + $0x28] sm:$0xff]  ;;  %v1112_v9 = vld [vmem:[#allocation7] sm:$0xff]  ;;  %v1115_v10 = vld [vmem:[#allocation7 + $0x18] sm:$0xff] }
  0x22   :  { %v1118_v11 = vld [vmem:[#allocation7 + $0x30] sm:$0xff]  ;;  %v1113_v12 = vld [vmem:[#allocation7 + $0x8] sm:$0xff]  ;;  %v1116_v13 = vld [vmem:[#allocation7 + $0x20] sm:$0xff] }
  0x23   :  { %1155 = vmatpush.bf16.msra.mxu3 %v1126_v1  ;;  %291 = vmatpush.bf16.msra.mxu0 %v1126_v1  ;;  %v1119_v14 = vld [vmem:[#allocation7 + $0x38] sm:$0xff]  ;;  %v1114_v15 = vld [vmem:[#allocation7 + $0x10] sm:$0xff]  ;;  %v1496_v41 = vld [vmem:[#allocation2 + $0x8] sm:$0xff] }
  0x24   :  { %1154 = vmatpush.bf16.msra.mxu1 %v1126_v1  ;;  %v1493_v40 = vld [vmem:[#allocation2] sm:$0xff]  ;;  %v1499_v42 = vld [vmem:[#allocation2 + $0x10] sm:$0xff]  ;;  %v1502_v43 = vld [vmem:[#allocation2 + $0x18] sm:$0xff] }
  0x25   :  { %v1505_v44 = vld [vmem:[#allocation2 + $0x20] sm:$0xff]  ;;  %v1508_v46 = vld [vmem:[#allocation2 + $0x28] sm:$0xff]  ;;  %v1134_v47 = vld [vmem:[#allocation10 + $0x30] sm:$0xff] }
  0x26   :  { %v1135_v45 = vld [vmem:[#allocation10 + $0x38] sm:$0xff]  ;;  %v1133_v48 = vld [vmem:[#allocation10 + $0x28] sm:$0xff]  ;;  %v1132_v49 = vld [vmem:[#allocation10 + $0x20] sm:$0xff] }
  0x27   :  { %1157 = vmatpush.bf16.msra.mxu3 %v1125_v2  ;;  %292 = vmatpush.bf16.msra.mxu0 %v1125_v2  ;;  %v1131_v50 = vld [vmem:[#allocation10 + $0x18] sm:$0xff]  ;;  %v1511_v51 = vld [vmem:[#allocation2 + $0x30] sm:$0xff]  ;;  %v1128_v54 = vld [vmem:[#allocation10] sm:$0xff] }
  0x28   :  { %1156 = vmatpush.bf16.msra.mxu1 %v1125_v2  ;;  %536 = vmatpush.bf16.msra.mxu2 %v1135_v45  ;;  %v1130_v52 = vld [vmem:[#allocation10 + $0x10] sm:$0xff]  ;;  %v1129_v53 = vld [vmem:[#allocation10 + $0x8] sm:$0xff]  ;;  %v1178_v57 = vld [vmem:[%s1544_s4] ss:$0 sm:$0xff] }
  0x29   :  { %v1514_v55 = vld [vmem:[#allocation2 + $0x38] sm:$0xff] }
  0x2b   :  { %1159 = vmatpush.bf16.msra.mxu3 %v1124_v3  ;;  %293 = vmatpush.bf16.msra.mxu0 %v1124_v3 }
  0x2c   :  { %1158 = vmatpush.bf16.msra.mxu1 %v1124_v3  ;;  %537 = vmatpush.bf16.msra.mxu2 %v1134_v47 }
  0x2f   :  { %1161 = vmatpush.bf16.msra.mxu3 %v1123_v4  ;;  %294 = vmatpush.bf16.msra.mxu0 %v1123_v4 }
  0x30   :  { %1160 = vmatpush.bf16.msra.mxu1 %v1123_v4  ;;  %538 = vmatpush.bf16.msra.mxu2 %v1133_v48 }
  0x33   :  { %1163 = vmatpush.bf16.msra.mxu3 %v1122_v5  ;;  %295 = vmatpush.bf16.msra.mxu0 %v1122_v5 }
  0x34   :  { %1162 = vmatpush.bf16.msra.mxu1 %v1122_v5  ;;  %539 = vmatpush.bf16.msra.mxu2 %v1132_v49 }
  0x37   :  { %1165 = vmatpush.bf16.msra.mxu3 %v1121_v6  ;;  %296 = vmatpush.bf16.msra.mxu0 %v1121_v6 }
  0x38   :  { %1164 = vmatpush.bf16.msra.mxu1 %v1121_v6  ;;  %540 = vmatpush.bf16.msra.mxu2 %v1131_v50 }
  0x3b   :  { %1167 = vmatpush.bf16.msra.mxu3 %v1120_v7  ;;  %297 = vmatpush.bf16.msra.mxu0 %v1120_v7 }
  0x3c   :  { %1166 = vmatpush.bf16.msra.mxu1 %v1120_v7  ;;  %541 = vmatpush.bf16.msra.mxu2 %v1130_v52 }
  0x3e   :  { %323 = vmatmul.bf16.vlgmr.msra.gmra.mxu3 %v1117_v8  ;;  %298 = vmatmul.bf16.vlgmr.msra.gmra.mxu0 %v1112_v9 }
  0x3f   :  { %313 = vmatmul.bf16.vlgmr.msra.gmra.mxu1 %v1115_v10 }
  0x40   :  { %542 = vmatpush.bf16.msra.mxu2 %v1129_v53 }
  0x44   :  { %543 = vmatpush.bf16.msra.mxu2 %v1128_v54 }
  0x4e   :  { %328 = vmatmul.bf16.gmra.mxu3 %v1118_v11  ;;  %303 = vmatmul.bf16.gmra.mxu0 %v1113_v12 }
  0x4f   :  { %318 = vmatmul.bf16.gmra.mxu1 %v1116_v13 }
  0x5e   :  { %333 = vmatmul.bf16.gmra.mxu3 %v1119_v14  ;;  %308 = vmatmul.bf16.gmra.mxu0 %v1114_v15 }
  0xbb   :  { %v299_v18 = vpop.f32.mrf.mxu0 }
  0xbc   :  { %v314_v21 = vpop.f32.mrf.mxu1 }
  0xc1   :  { %v324_v16 = vpop.f32.mrf.mxu3 }
  0xc3   :  { %v301_v20 = vpop.f32.mrf.mxu0 }
  0xc4   :  { %v316_v24 = vpop.f32.mrf.mxu1  ;;  %v339_v39 = vpack.c.bf16 %v301_v20, %v299_v18 }
  0xc5   :  { %v342_v35 = vpack.c.bf16 %v316_v24, %v314_v21 }
  0xc9   :  { %v326_v17 = vpop.f32.mrf.mxu3 }
  0xca   :  { %v344_v32 = vpack.c.bf16 %v326_v17, %v324_v16 }
  0xcb   :  { %v304_v23 = vpop.f32.mrf.mxu0 }
  0xcc   :  { %v319_v27 = vpop.f32.mrf.mxu1 }
  0xd1   :  { %v329_v19 = vpop.f32.mrf.mxu3 }
  0xd3   :  { %v306_v26 = vpop.f32.mrf.mxu0 }
  0xd4   :  { %v321_v33 = vpop.f32.mrf.mxu1  ;;  %v340_v38 = vpack.c.bf16 %v306_v26, %v304_v23 }
  0xd5   :  { %v343_v34 = vpack.c.bf16 %v321_v33, %v319_v27 }
  0xd9   :  { %v331_v22 = vpop.f32.mrf.mxu3 }
  0xda   :  { %v345_v30 = vpack.c.bf16 %v331_v22, %v329_v19 }
  0xdb   :  { %v309_v31 = vpop.f32.mrf.mxu0 }
  0xe1   :  { %v334_v25 = vpop.f32.mrf.mxu3 }
  0xe3   :  { %v311_v36 = vpop.f32.mrf.mxu0 }
  0xe4   :  { %v341_v37 = vpack.c.bf16 %v311_v36, %v309_v31 }
  0xe9   :  { %v336_v28 = vpop.f32.mrf.mxu3 }
  0xea   :  { %v346_v29 = vpack.c.bf16 %v336_v28, %v334_v25 }
  0xec   :  { %399 = vmatpush.bf16.msrb.mxu1 %v346_v29 }
  0xf0   :  { %400 = vmatpush.bf16.msrb.mxu1 %v345_v30 }
  0xf4   :  { %401 = vmatpush.bf16.msrb.mxu1 %v344_v32 }
  0xf8   :  { %402 = vmatpush.bf16.msrb.mxu1 %v343_v34 }
  0xfc   :  { %403 = vmatpush.bf16.msrb.mxu1 %v342_v35 }
 0x100   :  { %404 = vmatpush.bf16.msrb.mxu1 %v341_v37 }
 0x104   :  { %405 = vmatpush.bf16.msrb.mxu1 %v340_v38 }
 0x108   :  { %406 = vmatpush.bf16.msrb.mxu1 %v339_v39 }
 0x10b   :  { %407 = vmatmul.bf16.vlgmr.msrb.gmra.mxu1 %v1493_v40 }
 0x11b   :  { %412 = vmatmul.bf16.gmra.mxu1 %v1496_v41 }
 0x12b   :  { %417 = vmatmul.bf16.gmra.mxu1 %v1499_v42 }
 0x13b   :  { %422 = vmatmul.bf16.gmra.mxu1 %v1502_v43 }
 0x14b   :  { %427 = vmatmul.bf16.gmra.mxu1 %v1505_v44 }
 0x15b   :  { %432 = vmatmul.bf16.gmra.mxu1 %v1508_v46 }
 0x16b   :  { %437 = vmatmul.bf16.gmra.mxu1 %v1511_v51 }
 0x17b   :  { %442 = vmatmul.bf16.gmra.mxu1 %v1514_v55 }
 0x188   :  { %v408_v56 = vpop.f32.mrf.mxu1 }
 0x189   :  { %v409_v58 = vadd.f32 %v1178_v57, %v408_v56 }
 0x18b   :  { %v448_v61 = vmax.f32 %v409_v58, 0.0 }
 0x190   :  { %v410_v59 = vpop.f32.mrf.mxu1 }
 0x191   :  { %v411_v60 = vadd.f32 %v1178_v57, %v410_v59 }
 0x193   :  { %v449_v62 = vmax.f32 %v411_v60, 0.0 }
 0x195   :  { %v464_v63 = vpack.c.bf16 %v449_v62, %v448_v61 }
 0x197   :  { %544 = vmatmul.bf16.vlgmr.msra.gmra.mxu2 %v464_v63 }
 0x198   :  { %v413_v0 = vpop.f32.mrf.mxu1 }
 0x199   :  { %v414_v1 = vadd.f32 %v1178_v57, %v413_v0 }
 0x19b   :  { %v450_v4 = vmax.f32 %v414_v1, 0.0 }
 0x1a0   :  { %v415_v2 = vpop.f32.mrf.mxu1 }
 0x1a1   :  { %v416_v3 = vadd.f32 %v1178_v57, %v415_v2 }
 0x1a3   :  { %v451_v5 = vmax.f32 %v416_v3, 0.0 }
 0x1a5   :  { %v465_v6 = vpack.c.bf16 %v451_v5, %v450_v4 }
 0x1a7   :  { %549 = vmatmul.bf16.gmra.mxu2 %v465_v6 }
 0x1a8   :  { %v418_v7 = vpop.f32.mrf.mxu1 }
 0x1a9   :  { %v419_v8 = vadd.f32 %v1178_v57, %v418_v7 }
 0x1ab   :  { %v452_v11 = vmax.f32 %v419_v8, 0.0 }
 0x1b0   :  { %v420_v9 = vpop.f32.mrf.mxu1 }
 0x1b1   :  { %v421_v10 = vadd.f32 %v1178_v57, %v420_v9 }
 0x1b3   :  { %v453_v12 = vmax.f32 %v421_v10, 0.0 }
 0x1b5   :  { %v466_v13 = vpack.c.bf16 %v453_v12, %v452_v11 }
 0x1b7   :  { %554 = vmatmul.bf16.gmra.mxu2 %v466_v13 }
 0x1b8   :  { %v423_v14 = vpop.f32.mrf.mxu1 }
 0x1b9   :  { %v424_v15 = vadd.f32 %v1178_v57, %v423_v14 }
 0x1bb   :  { %v454_v18 = vmax.f32 %v424_v15, 0.0 }
 0x1c0   :  { %v425_v16 = vpop.f32.mrf.mxu1 }
 0x1c1   :  { %v426_v17 = vadd.f32 %v1178_v57, %v425_v16 }
 0x1c3   :  { %v455_v19 = vmax.f32 %v426_v17, 0.0  ;;  %v1143_v17 = vld [vmem:[#allocation11 + $0x38] sm:$0xff] }
 0x1c4   :  { %734 = vmatpush.bf16.msrb.mxu0 %v1143_v17 }
 0x1c5   :  { %v467_v20 = vpack.c.bf16 %v455_v19, %v454_v18  ;;  %v1142_v18 = vld [vmem:[#allocation11 + $0x30] sm:$0xff]  ;;  %v1141_v19 = vld [vmem:[#allocation11 + $0x28] sm:$0xff] }
 0x1c7   :  { %559 = vmatmul.bf16.gmra.mxu2 %v467_v20  ;;  %v1140_v20 = vld [vmem:[#allocation11 + $0x20] sm:$0xff] }
 0x1c8   :  { %v428_v21 = vpop.f32.mrf.mxu1  ;;  %735 = vmatpush.bf16.msrb.mxu0 %v1142_v18 }
 0x1c9   :  { %v429_v22 = vadd.f32 %v1178_v57, %v428_v21 }
 0x1cb   :  { %v456_v25 = vmax.f32 %v429_v22, 0.0 }
 0x1cc   :  { %736 = vmatpush.bf16.msrb.mxu0 %v1141_v19 }
 0x1d0   :  { %v430_v23 = vpop.f32.mrf.mxu1  ;;  %737 = vmatpush.bf16.msrb.mxu0 %v1140_v20 }
 0x1d1   :  { %v431_v24 = vadd.f32 %v1178_v57, %v430_v23 }
 0x1d3   :  { %v457_v26 = vmax.f32 %v431_v24, 0.0 }
 0x1d5   :  { %v468_v27 = vpack.c.bf16 %v457_v26, %v456_v25 }
 0x1d7   :  { %564 = vmatmul.bf16.gmra.mxu2 %v468_v27 }
 0x1d8   :  { %v433_v28 = vpop.f32.mrf.mxu1 }
 0x1d9   :  { %v434_v29 = vadd.f32 %v1178_v57, %v433_v28 }
 0x1db   :  { %v458_v32 = vmax.f32 %v434_v29, 0.0 }
 0x1e0   :  { %v435_v30 = vpop.f32.mrf.mxu1 }
 0x1e1   :  { %v436_v31 = vadd.f32 %v1178_v57, %v435_v30 }
 0x1e3   :  { %v459_v33 = vmax.f32 %v436_v31, 0.0 }
 0x1e5   :  { %v469_v34 = vpack.c.bf16 %v459_v33, %v458_v32 }
 0x1e7   :  { %569 = vmatmul.bf16.gmra.mxu2 %v469_v34 }
 0x1e8   :  { %v438_v35 = vpop.f32.mrf.mxu1 }
 0x1e9   :  { %v439_v36 = vadd.f32 %v1178_v57, %v438_v35 }
 0x1eb   :  { %v460_v39 = vmax.f32 %v439_v36, 0.0 }
 0x1f0   :  { %v440_v37 = vpop.f32.mrf.mxu1 }
 0x1f1   :  { %v441_v38 = vadd.f32 %v1178_v57, %v440_v37 }
 0x1f3   :  { %v461_v45 = vmax.f32 %v441_v38, 0.0 }
 0x1f5   :  { %v470_v47 = vpack.c.bf16 %v461_v45, %v460_v39 }
 0x1f7   :  { %574 = vmatmul.bf16.gmra.mxu2 %v470_v47 }
 0x1f8   :  { %v443_v48 = vpop.f32.mrf.mxu1 }
 0x1f9   :  { %v444_v49 = vadd.f32 %v1178_v57, %v443_v48 }
 0x1fb   :  { %v462_v53 = vmax.f32 %v444_v49, 0.0 }
 0x200   :  { %v445_v50 = vpop.f32.mrf.mxu1 }
 0x201   :  { %v446_v52 = vadd.f32 %v1178_v57, %v445_v50 }
 0x203   :  { %v463_v54 = vmax.f32 %v446_v52, 0.0 }
 0x205   :  { %v471_v56 = vpack.c.bf16 %v463_v54, %v462_v53 }
 0x207   :  { %579 = vmatmul.bf16.gmra.mxu2 %v471_v56 }
 0x21a   :  { %v545_v58 = vpop.f32.mrf.mxu2 }
 0x222   :  { %v547_v59 = vpop.f32.mrf.mxu2 }
 0x223   :  { %v585_v60 = vpack.c.bf16 %v547_v59, %v545_v58 }
 0x22a   :  { %v550_v61 = vpop.f32.mrf.mxu2 }
 0x232   :  { %v552_v62 = vpop.f32.mrf.mxu2 }
 0x233   :  { %v586_v63 = vpack.c.bf16 %v552_v62, %v550_v61 }
 0x23a   :  { %v555_v0 = vpop.f32.mrf.mxu2 }
 0x242   :  { %v557_v1 = vpop.f32.mrf.mxu2 }
 0x243   :  { %v587_v2 = vpack.c.bf16 %v557_v1, %v555_v0 }
 0x24a   :  { %v560_v3 = vpop.f32.mrf.mxu2 }
 0x252   :  { %v562_v4 = vpop.f32.mrf.mxu2 }
 0x253   :  { %v588_v5 = vpack.c.bf16 %v562_v4, %v560_v3 }
 0x25a   :  { %v565_v6 = vpop.f32.mrf.mxu2 }
 0x262   :  { %v567_v7 = vpop.f32.mrf.mxu2 }
 0x263   :  { %v589_v16 = vpack.c.bf16 %v567_v7, %v565_v6 }
 0x26a   :  { %v570_v8 = vpop.f32.mrf.mxu2 }
 0x272   :  { %v572_v57 = vpop.f32.mrf.mxu2 }
 0x273   :  { %v590_v15 = vpack.c.bf16 %v572_v57, %v570_v8 }
 0x27a   :  { %v575_v9 = vpop.f32.mrf.mxu2 }
 0x282   :  { %v577_v10 = vpop.f32.mrf.mxu2 }
 0x283   :  { %v591_v14 = vpack.c.bf16 %v577_v10, %v575_v9 }
 0x28a   :  { %v580_v11 = vpop.f32.mrf.mxu2 }
 0x292   :  { %v582_v12 = vpop.f32.mrf.mxu2 }
 0x293   :  { %v592_v13 = vpack.c.bf16 %v582_v12, %v580_v11 }
 0x295   :  { %597 = vmatpush.bf16.msrb.mxu3 %v592_v13 }
 0x299   :  { %598 = vmatpush.bf16.msrb.mxu3 %v591_v14 }
 0x29d   :  { %599 = vmatpush.bf16.msrb.mxu3 %v590_v15 }
 0x2a1   :  { %600 = vmatpush.bf16.msrb.mxu3 %v589_v16 }
 0x2a5   :  { %601 = vmatpush.bf16.msrb.mxu3 %v588_v5 }
 0x2a9   :  { %602 = vmatpush.bf16.msrb.mxu3 %v587_v2 }
 0x2ad   :  { %603 = vmatpush.bf16.msrb.mxu3 %v586_v63 }
 0x2b1   :  { %604 = vmatpush.bf16.msrb.mxu3 %v585_v60 }
 0x2b4   :  { %605 = vmatmul.bf16.vlgmr.msrb.gmra.mxu3 %v1493_v40  ;;  %v1139_v40 = vld [vmem:[#allocation11 + $0x18] sm:$0xff] }
 0x2b5   :  { %738 = vmatpush.bf16.msrb.mxu0 %v1139_v40 }
 0x2c4   :  { %610 = vmatmul.bf16.gmra.mxu3 %v1496_v41  ;;  %v1138_v41 = vld [vmem:[#allocation11 + $0x10] sm:$0xff] }
 0x2c5   :  { %739 = vmatpush.bf16.msrb.mxu0 %v1138_v41 }
 0x2d4   :  { %615 = vmatmul.bf16.gmra.mxu3 %v1499_v42  ;;  %v1137_v42 = vld [vmem:[#allocation11 + $0x8] sm:$0xff] }
 0x2d5   :  { %740 = vmatpush.bf16.msrb.mxu0 %v1137_v42 }
 0x2e4   :  { %620 = vmatmul.bf16.gmra.mxu3 %v1502_v43  ;;  %v1136_v43 = vld [vmem:[#allocation11] sm:$0xff] }
 0x2e5   :  { %741 = vmatpush.bf16.msrb.mxu0 %v1136_v43 }
 0x2f4   :  { %625 = vmatmul.bf16.gmra.mxu3 %v1505_v44 }
 0x304   :  { %630 = vmatmul.bf16.gmra.mxu3 %v1508_v46  ;;  %v1179_v46 = vld [vmem:[%s1546_s6] ss:$0 sm:$0xff] }
 0x314   :  { %635 = vmatmul.bf16.gmra.mxu3 %v1511_v51 }
 0x324   :  { %640 = vmatmul.bf16.gmra.mxu3 %v1514_v55 }
 0x337   :  { %v606_v44 = vpop.f32.mrf.mxu3 }
 0x338   :  { %v607_v21 = vadd.f32 %v1179_v46, %v606_v44 }
 0x33a   :  { %v646_v24 = vmax.f32 %v607_v21, 0.0 }
 0x33f   :  { %v608_v22 = vpop.f32.mrf.mxu3 }
 0x340   :  { %v609_v23 = vadd.f32 %v1179_v46, %v608_v22 }
 0x342   :  { %v647_v51 = vmax.f32 %v609_v23, 0.0 }
 0x344   :  { %v662_v25 = vpack.c.bf16 %v647_v51, %v646_v24 }
 0x346   :  { %742 = vmatmul.bf16.vlgmr.msrb.gmra.mxu0 %v662_v25 }
 0x347   :  { %v611_v26 = vpop.f32.mrf.mxu3 }
 0x348   :  { %v612_v27 = vadd.f32 %v1179_v46, %v611_v26 }
 0x34a   :  { %v648_v30 = vmax.f32 %v612_v27, 0.0 }
 0x34f   :  { %v613_v28 = vpop.f32.mrf.mxu3 }
 0x350   :  { %v614_v29 = vadd.f32 %v1179_v46, %v613_v28 }
 0x352   :  { %v649_v31 = vmax.f32 %v614_v29, 0.0 }
 0x354   :  { %v663_v32 = vpack.c.bf16 %v649_v31, %v648_v30 }
 0x356   :  { %747 = vmatmul.bf16.gmra.mxu0 %v663_v32  ;;  %v1151_v32 = vld [vmem:[#allocation13 + $0x38] sm:$0xff] }
 0x357   :  { %v616_v55 = vpop.f32.mrf.mxu3  ;;  %878 = vmatpush.bf16.msrb.mxu2 %v1151_v32 }
 0x358   :  { %v617_v33 = vadd.f32 %v1179_v46, %v616_v55  ;;  %v1150_v55 = vld [vmem:[#allocation13 + $0x30] sm:$0xff] }
 0x35a   :  { %v650_v36 = vmax.f32 %v617_v33, 0.0 }
 0x35b   :  { %879 = vmatpush.bf16.msrb.mxu2 %v1150_v55 }
 0x35f   :  { %v618_v34 = vpop.f32.mrf.mxu3 }
 0x360   :  { %v619_v35 = vadd.f32 %v1179_v46, %v618_v34  ;;  %v1149_v34 = vld [vmem:[#allocation13 + $0x28] sm:$0xff] }
 0x361   :  { %880 = vmatpush.bf16.msrb.mxu2 %v1149_v34 }
 0x362   :  { %v651_v37 = vmax.f32 %v619_v35, 0.0 }
 0x364   :  { %v664_v38 = vpack.c.bf16 %v651_v37, %v650_v36  ;;  %v1148_v36 = vld [vmem:[#allocation13 + $0x20] sm:$0xff] }
 0x365   :  { %881 = vmatpush.bf16.msrb.mxu2 %v1148_v36 }
 0x366   :  { %752 = vmatmul.bf16.gmra.mxu0 %v664_v38  ;;  %v1147_v38 = vld [vmem:[#allocation13 + $0x18] sm:$0xff] }
 0x367   :  { %v621_v39 = vpop.f32.mrf.mxu3 }
 0x368   :  { %v622_v45 = vadd.f32 %v1179_v46, %v621_v39  ;;  %v1146_v39 = vld [vmem:[#allocation13 + $0x10] sm:$0xff] }
 0x369   :  { %882 = vmatpush.bf16.msrb.mxu2 %v1147_v38 }
 0x36a   :  { %v652_v49 = vmax.f32 %v622_v45, 0.0  ;;  %v1145_v45 = vld [vmem:[#allocation13 + $0x8] sm:$0xff] }
 0x36d   :  { %883 = vmatpush.bf16.msrb.mxu2 %v1146_v39 }
 0x36f   :  { %v623_v47 = vpop.f32.mrf.mxu3 }
 0x370   :  { %v624_v48 = vadd.f32 %v1179_v46, %v623_v47  ;;  %v1144_v47 = vld [vmem:[#allocation13] sm:$0xff] }
 0x371   :  { %884 = vmatpush.bf16.msrb.mxu2 %v1145_v45 }
 0x372   :  { %v653_v50 = vmax.f32 %v624_v48, 0.0  ;;  %v783_v48 = vld [vmem:[#allocation5] sm:$0xf] }
 0x374   :  { %v665_v52 = vpack.c.bf16 %v653_v50, %v652_v49  ;;  %v1180_v49 = vld [vmem:[%s1548_s8] ss:$0 sm:$0xff] }
 0x375   :  { %885 = vmatpush.bf16.msrb.mxu2 %v1144_v47 }
 0x376   :  { %757 = vmatmul.bf16.gmra.mxu0 %v665_v52 }
 0x377   :  { %v626_v53 = vpop.f32.mrf.mxu3 }
 0x378   :  { %v627_v54 = vadd.f32 %v1179_v46, %v626_v53 }
 0x37a   :  { %v654_v59 = vmax.f32 %v627_v54, 0.0 }
 0x37f   :  { %v628_v56 = vpop.f32.mrf.mxu3 }
 0x380   :  { %v629_v58 = vadd.f32 %v1179_v46, %v628_v56  ;;  %v1181_v56 = vld [vmem:[%s1550_s10] ss:$0 sm:$0xff] }
 0x382   :  { %v655_v60 = vmax.f32 %v629_v58, 0.0 }
 0x384   :  { %v666_v61 = vpack.c.bf16 %v655_v60, %v654_v59 }
 0x386   :  { %762 = vmatmul.bf16.gmra.mxu0 %v666_v61 }
 0x387   :  { %v631_v62 = vpop.f32.mrf.mxu3 }
 0x388   :  { %v632_v63 = vadd.f32 %v1179_v46, %v631_v62 }
 0x38a   :  { %v656_v2 = vmax.f32 %v632_v63, 0.0 }
 0x38f   :  { %v633_v0 = vpop.f32.mrf.mxu3 }
 0x390   :  { %v634_v1 = vadd.f32 %v1179_v46, %v633_v0 }
 0x392   :  { %v657_v3 = vmax.f32 %v634_v1, 0.0 }
 0x394   :  { %v667_v4 = vpack.c.bf16 %v657_v3, %v656_v2 }
 0x396   :  { %767 = vmatmul.bf16.gmra.mxu0 %v667_v4 }
 0x397   :  { %v636_v5 = vpop.f32.mrf.mxu3 }
 0x398   :  { %v637_v6 = vadd.f32 %v1179_v46, %v636_v5 }
 0x39a   :  { %v658_v57 = vmax.f32 %v637_v6, 0.0 }
 0x39f   :  { %v638_v7 = vpop.f32.mrf.mxu3 }
 0x3a0   :  { %v639_v8 = vadd.f32 %v1179_v46, %v638_v7 }
 0x3a2   :  { %v659_v9 = vmax.f32 %v639_v8, 0.0 }
 0x3a4   :  { %v668_v10 = vpack.c.bf16 %v659_v9, %v658_v57 }
 0x3a6   :  { %772 = vmatmul.bf16.gmra.mxu0 %v668_v10 }
 0x3a7   :  { %v641_v11 = vpop.f32.mrf.mxu3 }
 0x3a8   :  { %v642_v12 = vadd.f32 %v1179_v46, %v641_v11 }
 0x3aa   :  { %v660_v15 = vmax.f32 %v642_v12, 0.0 }
 0x3af   :  { %v643_v13 = vpop.f32.mrf.mxu3 }
 0x3b0   :  { %v644_v14 = vadd.f32 %v1179_v46, %v643_v13 }
 0x3b2   :  { %v661_v16 = vmax.f32 %v644_v14, 0.0 }
 0x3b4   :  { %v669_v17 = vpack.c.bf16 %v661_v16, %v660_v15 }
 0x3b6   :  { %777 = vmatmul.bf16.gmra.mxu0 %v669_v17 }
 0x3c3   :  { %v743_v18 = vpop.f32.mrf.mxu0 }
 0x3cb   :  { %v745_v19 = vpop.f32.mrf.mxu0 }
 0x3cc   :  { %v784_v20 = vpack.c.bf16 %v745_v19, %v743_v18 }
 0x3d3   :  { %v748_v40 = vpop.f32.mrf.mxu0 }
 0x3db   :  { %v750_v41 = vpop.f32.mrf.mxu0 }
 0x3dc   :  { %v785_v42 = vpack.c.bf16 %v750_v41, %v748_v40 }
 0x3e3   :  { %v753_v43 = vpop.f32.mrf.mxu0 }
 0x3eb   :  { %v755_v44 = vpop.f32.mrf.mxu0 }
 0x3ec   :  { %v786_v21 = vpack.c.bf16 %v755_v44, %v753_v43 }
 0x3f3   :  { %v758_v22 = vpop.f32.mrf.mxu0 }
 0x3fb   :  { %v760_v23 = vpop.f32.mrf.mxu0 }
 0x3fc   :  { %v787_v24 = vpack.c.bf16 %v760_v23, %v758_v22 }
 0x403   :  { %v763_v51 = vpop.f32.mrf.mxu0 }
 0x40b   :  { %v765_v25 = vpop.f32.mrf.mxu0 }
 0x40c   :  { %v788_v37 = vpack.c.bf16 %v765_v25, %v763_v51 }
 0x413   :  { %v768_v26 = vpop.f32.mrf.mxu0 }
 0x41b   :  { %v770_v46 = vpop.f32.mrf.mxu0 }
 0x41c   :  { %v789_v35 = vpack.c.bf16 %v770_v46, %v768_v26 }
 0x423   :  { %v773_v27 = vpop.f32.mrf.mxu0 }
 0x42b   :  { %v775_v28 = vpop.f32.mrf.mxu0 }
 0x42c   :  { %v790_v33 = vpack.c.bf16 %v775_v28, %v773_v27 }
 0x433   :  { %v778_v29 = vpop.f32.mrf.mxu0 }
 0x43b   :  { %v780_v30 = vpop.f32.mrf.mxu0 }
 0x43c   :  { %v791_v31 = vpack.c.bf16 %v780_v30, %v778_v29 }
 0x43e   :  { %796 = vmatpush.bf16.msra.mxu1 %v791_v31 }
 0x442   :  { %797 = vmatpush.bf16.msra.mxu1 %v790_v33 }
 0x446   :  { %798 = vmatpush.bf16.msra.mxu1 %v789_v35 }
 0x44a   :  { %799 = vmatpush.bf16.msra.mxu1 %v788_v37 }
 0x44e   :  { %800 = vmatpush.bf16.msra.mxu1 %v787_v24 }
 0x452   :  { %801 = vmatpush.bf16.msra.mxu1 %v786_v21 }
 0x456   :  { %802 = vmatpush.bf16.msra.mxu1 %v785_v42 }
 0x45a   :  { %803 = vmatpush.bf16.msra.mxu1 %v784_v20 }
 0x45d   :  { %804 = vmatmul.bf16.vlgmr.msra.gmra.mxu1 %v783_v48 }
 0x4da   :  { %v805_v50 = vpop.f32.mrf.mxu1 }
 0x4db   :  { %v806_v52 = vadd.f32 %v1180_v49, %v805_v50 }
 0x4dd   :  { %v809_v53 = vpack.c.bf16 %v806_v52, %v806_v52 }
 0x4df   :  { %886 = vmatmul.bf16.vlgmr.msrb.gmra.mxu2 %v809_v53 }
 0x4e2   :  { %v807_v54 = vpop.f32.mrf.mxu1 }
 0x562   :  { %v887_v58 = vpop.f32.mrf.mxu2 }
 0x563   :  { %v888_v59 = vadd.f32 %v1181_v56, %v887_v58 }
 0x565   :  { %891 = vst [vmem:[#allocation14] sm:$0xff] %v888_v59 }
 0x566   :  { %902 = dma.vmem_to_hbm [thread:$0]  %s898_s3, 128, %s900_s16, [#allocation4]  }
 0x56a   :  { %v889_v60 = vpop.f32.mrf.mxu2 }
 0x56b   :  { %1382 = dma.done.wait [#allocation4], 128  }
 0x56c   :  { %1383 = vsyncadd [#allocation4], 4294967168 }
 0x56d   :  { %907 = vsyncpa [#allocation3], 1 }
 0x56e   :  { %908 = vsyncpa [#allocation6], 1 }
 0x56f   :  { %909 = vsyncpa [#allocation9], 1 }
 0x570   :  { %910 = vsyncpa [#allocation12], 1 }
 0x571   :  { %911 = vsyncpa [#allocation4], 1 }

</bundles_post_ra>
